<compile_context>
chip_gen: v5e
topology: v5e:2x2
jax: 0.10.0
libtpu: 0.0.40
codegen_flags: <defaults>
</compile_context>

<pallas_src>
import jax
import jax.numpy as jnp
from jax.experimental import pallas as pl
from jax.experimental.pallas import tpu as pltpu


def _round_up(v, m):
    return -(-v // m) * m


def attention_kernel(x_ref, w_ref, b_ref, o_ref):
    # x_ref: (TB, S, F)   w_ref: (1, F)   b_ref: (1, S)   o_ref: (TB, F)
    x = x_ref[...].astype(jnp.float32)                 # (TB, S, F)
    w = w_ref[...]                                     # (1, F) broadcasts over (TB, S, F)

    # eij = <x, w> along F: VPU multiply + XLU lane reduce (no MXU, N=1 is degenerate).
    eij = jnp.sum(x * w, axis=-1)                      # (TB, S)
    eij = jnp.tanh(eij + b_ref[...])                   # bias row (1, S) broadcasts
    a = jnp.exp(eij)                                   # values in [1/e, e] -> no overflow

    denom = jnp.sum(a, axis=-1, keepdims=True)         # (TB, 1), >= S/e > 0
    # EUP approximate reciprocal + one Newton step (tiny (TB,1) array): keeps
    # the divide off the VALU, recovers full f32 accuracy essentially for free.
    r = pl.reciprocal(denom, approx=True)
    r = r * (2.0 - denom * r)
    a = a * r + 1e-10                                  # attention weights, f32

    # Weighted sum over the step dim: VPU multiply + sublane reduce (no MXU).
    out = jnp.sum(x * a[:, :, None], axis=1)           # (TB, F)
    o_ref[...] = out.astype(o_ref.dtype)


def _choose_block_b(B, S, F, *, x_tile_vmem_budget=6 << 20, target_grid_steps=8):
    """Batch block size: always a multiple of 8 (or exactly B).

    Constraints (from perf review):
      * x tile stays in the few-MiB class *measured in VMEM bytes*, i.e. with
        the trailing (S, F) dims padded to (8, 128) layout tiles -- F < 128
        inflates the on-chip footprint, so account for it here.
      * Keep the grid at >= target_grid_steps steps when B allows, so both v7x
        TensorCores get work and DMA/compute overlap across pipeline stages.
    """
    if B <= 8:
        return B                                       # full dim satisfies (8,128) rule
    per_row = _round_up(S, 8) * _round_up(F, 128) * 4  # padded f32 VMEM bytes per batch row
    mem_cap = max(8, (x_tile_vmem_budget // per_row) // 8 * 8)
    grid_cap = max(8, (B // target_grid_steps) // 8 * 8)
    return max(8, min(mem_cap, grid_cap))


def _vmem_limit_bytes(x_tile_vmem_bytes):
    """Generation-aware VMEM limit: actual need + slack, <= ~2/3 of physical."""
    try:
        cap = pltpu.get_tpu_info().vmem_capacity_bytes
    except Exception:
        cap = 64 << 20                                 # assume smallest (v7x per-TC)
    # double-buffered x + room for two tile-sized f32 temporaries (if Mosaic
    # materializes x*w / x*a) + output buffers / weight / bias / internals.
    need = 4 * x_tile_vmem_bytes + (8 << 20)
    return int(min(max(need, 24 << 20), (2 * cap) // 3, 48 << 20))


def attention_forward(x, weight, bias, *, block_b=None):
    """x: (B, S, F), weight: (F, 1), bias: (S,)  ->  (B, F)."""
    B, S, F = x.shape
    if block_b is None:
        block_b = _choose_block_b(B, S, F)
    block_b = min(block_b, B)
    if block_b != B and block_b % 8 != 0:
        block_b = max(8, (block_b // 8) * 8)           # keep the out block sublane-aligned

    # Zero-pad B so the grid divides exactly: no partial blocks, no masked
    # stores.  Padded rows compute finite garbage (denom >= S/e) and are sliced
    # off; for auto-chosen block_b this only triggers when B % 8 != 0.
    num_blocks = pl.cdiv(B, block_b)
    B_pad = num_blocks * block_b
    x_in = x if B_pad == B else jnp.pad(x, ((0, B_pad - B), (0, 0), (0, 0)))

    w_row = weight.reshape(1, F).astype(jnp.float32)   # lane-dense row
    b_row = bias.reshape(1, S).astype(jnp.float32)     # lane-dense row

    x_tile_vmem = block_b * _round_up(S, 8) * _round_up(F, 128) * 4

    out = pl.pallas_call(
        attention_kernel,
        out_shape=jax.ShapeDtypeStruct((B_pad, F), x.dtype),
        grid_spec=pltpu.PrefetchScalarGridSpec(
            num_scalar_prefetch=0,
            grid=(num_blocks,),                        # exact by construction
            in_specs=[
                pl.BlockSpec((block_b, S, F), lambda i: (i, 0, 0)),  # x tile
                pl.BlockSpec((1, F), lambda i: (0, 0)),              # weight (shared)
                pl.BlockSpec((1, S), lambda i: (0, 0)),              # bias   (shared)
            ],
            out_specs=pl.BlockSpec((block_b, F), lambda i: (i, 0)),
        ),
        compiler_params=pltpu.CompilerParams(
            dimension_semantics=("parallel",),         # megacore-shardable on v7x
            vmem_limit_bytes=_vmem_limit_bytes(x_tile_vmem),
        ),
    )(x_in, w_row, b_row)

    return out if B_pad == B else out[:B]


def reference_forward(x, weight, bias):
    B, S, F = x.shape
    eij = (x.reshape(-1, F) @ weight).reshape(B, S) + bias
    eij = jnp.tanh(eij)
    a = jnp.exp(eij)
    a = a / jnp.sum(a, axis=1, keepdims=True) + 1e-10
    return jnp.sum(x * a[..., None], axis=1)


if __name__ == "__main__":
    B, S, F = 2, 8, 32          # batch=2, step_dim=8, feature_dim=32

    key = jax.random.PRNGKey(0)
    kx, kw = jax.random.split(key)

    x = jax.random.normal(kx, (B, S, F), dtype=jnp.float32)

    # Deterministic xavier_uniform_ for weight (F, 1): bound = sqrt(6/(F+1))
    bound = (6.0 / (F + 1)) ** 0.5
    weight = jax.random.uniform(kw, (F, 1), minval=-bound, maxval=bound,
                                dtype=jnp.float32)
    bias = jnp.zeros((S,), dtype=jnp.float32)   # nn.Parameter(torch.zeros(step_dim))

    out = attention_forward(x, weight, bias)
    out = jax.block_until_ready(out)

    ref = reference_forward(x, weight, bias)
    assert out.shape == (B, F)
    assert jnp.allclose(out, ref, atol=1e-5, rtol=1e-5)

    print("KERNEL_OK")
</pallas_src>

<mosaic_0001>
module attributes {stable_mosaic.version = 11 : i64} {
  func.func @attention_kernel(%arg0: i32, %arg1: memref<2x8x32xf32, #tpu.memory_space<vmem>>, %arg2: memref<1x32xf32, #tpu.memory_space<vmem>>, %arg3: memref<1x8xf32, #tpu.memory_space<vmem>>, %arg4: memref<2x32xf32, #tpu.memory_space<vmem>>) attributes {dimension_semantics = [#tpu.dimension_semantics<parallel>], iteration_bounds = array<i64: 1>, scalar_prefetch = 0 : i64, scratch_operands = 0 : i64, tpu.core_type = #tpu.core_type<tc>, window_params = [{transform_indices = @transform_0, window_bounds = array<i64: 2, 8, 32>}, {pipeline_mode = #tpu.pipeline_mode<synchronous>, transform_indices = @transform_1, window_bounds = array<i64: 1, 32>}, {pipeline_mode = #tpu.pipeline_mode<synchronous>, transform_indices = @transform_2, window_bounds = array<i64: 1, 8>}, {transform_indices = @transform_3, window_bounds = array<i64: 2, 32>}]} {
    %c0 = arith.constant 0 : index
    %c0_0 = arith.constant 0 : index
    %c0_1 = arith.constant 0 : index
    %0 = vector.load %arg1[%c0, %c0_0, %c0_1] : memref<2x8x32xf32, #tpu.memory_space<vmem>>, vector<2x8x32xf32>
    %c0_2 = arith.constant 0 : index
    %c0_3 = arith.constant 0 : index
    %1 = vector.load %arg2[%c0_2, %c0_3] : memref<1x32xf32, #tpu.memory_space<vmem>>, vector<1x32xf32>
    %2 = vector.shape_cast %1 : vector<1x32xf32> to vector<1x1x32xf32>
    %3 = vector.broadcast %2 : vector<1x1x32xf32> to vector<2x8x32xf32>
    %4 = arith.mulf %0, %3 : vector<2x8x32xf32>
    %cst = arith.constant dense<0.000000e+00> : vector<2x8xf32>
    %5 = vector.multi_reduction <add>, %4, %cst [2] : vector<2x8x32xf32> to vector<2x8xf32>
    %c0_4 = arith.constant 0 : index
    %c0_5 = arith.constant 0 : index
    %6 = vector.load %arg3[%c0_4, %c0_5] : memref<1x8xf32, #tpu.memory_space<vmem>>, vector<1x8xf32>
    %7 = vector.broadcast %6 : vector<1x8xf32> to vector<2x8xf32>
    %8 = arith.addf %5, %7 : vector<2x8xf32>
    %9 = math.tanh %8 : vector<2x8xf32>
    %10 = math.exp %9 : vector<2x8xf32>
    %cst_6 = arith.constant dense<0.000000e+00> : vector<2xf32>
    %11 = vector.multi_reduction <add>, %10, %cst_6 [1] : vector<2x8xf32> to vector<2xf32>
    %12 = vector.shape_cast %11 : vector<2xf32> to vector<2x1xf32>
    %13 = tpu.reciprocal %12 {approx = true} : vector<2x1xf32> -> vector<2x1xf32>
    %14 = arith.mulf %12, %13 : vector<2x1xf32>
    %cst_7 = arith.constant 2.000000e+00 : f32
    %15 = vector.broadcast %cst_7 : f32 to vector<2x1xf32>
    %16 = arith.subf %15, %14 : vector<2x1xf32>
    %17 = arith.mulf %13, %16 : vector<2x1xf32>
    %18 = vector.broadcast %17 : vector<2x1xf32> to vector<2x8xf32>
    %19 = arith.mulf %10, %18 : vector<2x8xf32>
    %cst_8 = arith.constant 1.000000e-10 : f32
    %20 = vector.broadcast %cst_8 : f32 to vector<2x8xf32>
    %21 = arith.addf %19, %20 : vector<2x8xf32>
    %22 = vector.shape_cast %21 : vector<2x8xf32> to vector<2x8x1xf32>
    %23 = vector.broadcast %22 : vector<2x8x1xf32> to vector<2x8x32xf32>
    %24 = arith.mulf %0, %23 : vector<2x8x32xf32>
    %cst_9 = arith.constant dense<0.000000e+00> : vector<2x32xf32>
    %25 = vector.multi_reduction <add>, %24, %cst_9 [1] : vector<2x8x32xf32> to vector<2x32xf32>
    %c0_10 = arith.constant 0 : index
    %c0_11 = arith.constant 0 : index
    %26 = vector.load %arg4[%c0_10, %c0_11] : memref<2x32xf32, #tpu.memory_space<vmem>>, vector<2x32xf32>
    tpu.vector_store %arg4[%c0_10, %c0_11], %25 {strides = array<i32>} : memref<2x32xf32, #tpu.memory_space<vmem>>, vector<2x32xf32>,
    return
  }
  func.func @transform_0(%arg0: i32) -> (i32, i32, i32) {
    %c0_i32 = arith.constant 0 : i32
    %c0_i32_0 = arith.constant 0 : i32
    %c0_i32_1 = arith.constant 0 : i32
    return %arg0, %c0_i32, %c0_i32_0 : i32, i32, i32
  }
  func.func @transform_1(%arg0: i32) -> (i32, i32) {
    %c0_i32 = arith.constant 0 : i32
    %c0_i32_0 = arith.constant 0 : i32
    %c0_i32_1 = arith.constant 0 : i32
    return %c0_i32, %c0_i32_0 : i32, i32
  }
  func.func @transform_2(%arg0: i32) -> (i32, i32) {
    %c0_i32 = arith.constant 0 : i32
    %c0_i32_0 = arith.constant 0 : i32
    %c0_i32_1 = arith.constant 0 : i32
    return %c0_i32, %c0_i32_0 : i32, i32
  }
  func.func @transform_3(%arg0: i32) -> (i32, i32) {
    %c0_i32 = arith.constant 0 : i32
    %c0_i32_0 = arith.constant 0 : i32
    return %arg0, %c0_i32 : i32, i32
  }
}

</mosaic_0001>

<bundles_post_ra>
// kernel: tpu_custom_call.1
= control target key start
LH: loop header
LB: loop body
LE: loop exit
PB: predicated region body
PF: predicated region fallthrough
CT: control target
= control target key end

     0   :  { %8 = vsyncpa [#allocation3], 0  ;;  %s304_s0 = inlined_call_operand.hbm [shape: f32[2,8,32], index: 0, kind: input, shape index: {}]   ;;  %s305_s1 = inlined_call_operand.hbm [shape: f32[1,32], index: 1, kind: input, shape index: {}]   ;;  %s306_s2 = inlined_call_operand.vmem [shape: f32[1,8], index: 2, kind: input, shape index: {}]   ;;  %s307_s3 = inlined_call_operand.hbm [shape: f32[2,32], index: 3, kind: output, shape index: {}]  }
   0x1   :  { %9 = vsyncpa [#allocation6], 0 }
   0x2   :  { %10 = vsyncpa [#allocation4], 0  ;;  %s15_s14 = sshll.u32 %s304_s0, 4  ;;  %s260_s15 = smov [#allocation2]   ;;  %s16_s14 = int_to_ptr.hbm [resolvable:$true] %s15_s14 }
   0x3   :  { %s17_s16 = sshll.u32 %s260_s15, 4  ;;  %s29_s19 = sshll.u32 %s305_s1, 4  ;;  %s18_s16 = int_to_ptr.vmem [resolvable:$true] %s17_s16  ;;  %s30_s19 = int_to_ptr.hbm [resolvable:$true] %s29_s19 }
   0x4   :  { %s261_s20 = smov 128   ;;  %s262_s21 = smov 8  }
   0x5   :  { %23 = dma.hbm_to_vmem [thread:$0]  %s16_s14, 256, %s18_s16, [#allocation3], %s261_s20, %s261_s20, %s262_s21  }
   0x6   :  { %s263_s22 = smov [#allocation5]  }
   0x7   :  { %s31_s23 = sshll.u32 %s263_s22, 4  ;;  %s32_s23 = int_to_ptr.vmem [resolvable:$true] %s31_s23 }
   0x8   :  { %34 = dma.hbm_to_vmem [thread:$0]  %s30_s19, 16, %s32_s23, [#allocation6]  }
   0x9   :  { %254 = dma.done.wait [#allocation3], 256  }
   0xa   :  { %255 = vsyncadd [#allocation3], 4294967040 }
   0xb   :  { %256 = dma.done.wait [#allocation6], 16  }
   0xc   :  { %257 = vsyncadd [#allocation6], 4294967280  ;;  %v63_v0 = vlaneseq  ;;  %v45_v2 = vld [vmem:[#allocation2] sm:$0xff]  ;;  %v170_v3 = vld [vmem:[#allocation5] ss:$0 sm:$0xff]  ;;  %vm53_vm0 = vcmask 261120  }
   0xd   :  { %v171_v4 = vld [vmem:[%s306_s2] ss:$0 sm:$0xff]  ;;  %v51_v5 = vmul.f32 %v170_v3, %v45_v2  ;;  %v46_v6 = vld [vmem:[#allocation2 + $0x8] sm:$0xff]  ;;  %v264_v10 = vmov 0   ;;  %vm90_vm1 = vcmask 1041409   ;;  %vm93_vm2 = vcmask 58368  }
   0xe   :  { %v64_v1 = vshrl.u32 %v63_v0, 7  ;;  %v52_v8 = vmul.f32 %v170_v3, %v46_v6  ;;  %168 = vset.pattern.permute.xlu2 %v264_v10  ;;  %169 = vset.pattern.permute.xlu0 %v264_v10  ;;  %v87_v22 = vand.u32 127, %v63_v0  ;;  %s265_s2 = smov [#allocation7]   ;;  %s149_s27 = sshll.u32 %s307_s3, 4  ;;  %vm140_vm3 = vcmask 254976   ;;  %s150_s27 = int_to_ptr.hbm [resolvable:$true] %s149_s27 }
   0xf   :  { %v54_v7 = vsel %vm53_vm0, %v51_v5, 0.0  ;;  %s147_s24 = sshll.u32 %s265_s2, 4  ;;  %s148_s24 = int_to_ptr.vmem [resolvable:$true] %s147_s24 }
  0x10   :  { %166 = vset.pattern.permute.xlu1 %v64_v1  ;;  %55 = vadd.xlane.f32.xlu0 %v54_v7  ;;  %v57_v9 = vsel %vm53_vm0, %v52_v8, 0.0 }
  0x18   :  { %67 = vperm.xlu1 %166, %v171_v4   ;;  %58 = vadd.xlane.f32.xlu0 %v57_v9 }
  0x20   :  { %167 = vset.pattern.permute.xlu1 %v264_v10 }
  0x83   :  { %v56_v12 = vpop.xlane.xlu0 %55 }
  0x8a   :  { %v68_v11 = vpop.permute.xlu1 %67 }
  0x8b   :  { %v70_v13 = vadd.f32 %v68_v11, %v56_v12  ;;  %v59_v14 = vpop.xlane.xlu0 %58 }
  0x8c   :  { %v71_v16 = vadd.f32 %v68_v11, %v59_v14 }
  0x8d   :  { %172 = vtanh.f32 %v70_v13 }
  0x8e   :  { %174 = vtanh.f32 %v71_v16 }
  0x93   :  { %v173_v15 = vpop.eup %172 }
  0x94   :  { %v74_v17 = vmul.f32 1.442695, %v173_v15  ;;  %v175_v18 = vpop.eup %174 }
  0x95   :  { %v76_v20 = vmul.f32 1.442695, %v175_v18 }
  0x96   :  { %176 = vpow2.f32 %v74_v17 }
  0x97   :  { %178 = vpow2.f32 %v76_v20 }
  0x9c   :  { %v177_v19 = vpop.eup %176 }
  0x9d   :  { %81 = vperm.xlu1 %167, %v177_v19   ;;  %v179_v21 = vpop.eup %178 }
  0x9e   :  { %84 = vperm.xlu2 %168, %v179_v21  }
  0xf8   :  { %v85_v23 = vpop.permute.xlu2 %84 }
  0xf9   :  { %v89_v25 = vperm.slane %v85_v23, %v87_v22 }
 0x10f   :  { %v82_v24 = vpop.permute.xlu1 %81 }
 0x110   :  { %v88_v26 = vperm.slane %v82_v24, %v87_v22 }
 0x112   :  { %v91_v27 = vsel %vm90_vm1, %v89_v25, %v88_v26 }
 0x113   :  { %v94_v28 = vsel %vm93_vm2, %v91_v27, 0.0 }
 0x114   :  { %95 = vadd.xlane.f32.xlu2 %v94_v28 }
 0x187   :  { %v96_v29 = vpop.xlane.xlu2 %95 }
 0x188   :  { %180 = vrcp.f32 %v96_v29 }
 0x18e   :  { %v181_v30 = vpop.eup %180 }
 0x18f   :  { %v98_v31 = vmul.f32 %v181_v30, %v96_v29 }
 0x191   :  { %v99_v32 = vsub.f32 2.0, %v98_v31 }
 0x193   :  { %v100_v33 = vmul.f32 %v181_v30, %v99_v32 }
 0x195   :  { %v102_v34 = vperm.slane %v100_v33, 0  ;;  %v103_v35 = vperm.slane %v100_v33, 1 }
 0x197   :  { %v107_v36 = vmul.f32 %v179_v21, %v103_v35  ;;  %v106_v37 = vmul.f32 %v177_v19, %v102_v34 }
 0x199   :  { %v109_v38 = vadd.f32 1e-10, %v107_v36  ;;  %v108_v39 = vadd.f32 1e-10, %v106_v37 }
 0x19b   :  { %117 = vperm.xlu1 %167, %v109_v38   ;;  %112 = vperm.xlu0 %169, %v108_v39  }
 0x20d   :  { %v118_v40 = vpop.permute.xlu1 %117  ;;  %v113_v41 = vpop.permute.xlu0 %112 }
 0x20e   :  { %v121_v42 = vmul.f32 %v118_v40, %v46_v6  ;;  %v120_v43 = vmul.f32 %v113_v41, %v45_v2 }
 0x210   :  { %v129_v44 = vsel %vm53_vm0, %v121_v42, 0.0  ;;  %v122_v45 = vsel %vm53_vm0, %v120_v43, 0.0 }
 0x211   :  { %v130_v46 = vrot.slane %v129_v44, 4  ;;  %v123_v47 = vrot.slane %v122_v45, 4 }
 0x213   :  { %v131_v48 = vadd.f32 %v130_v46, %v129_v44  ;;  %v124_v49 = vadd.f32 %v123_v47, %v122_v45 }
 0x215   :  { %v132_v50 = vrot.slane %v131_v48, 2  ;;  %v125_v51 = vrot.slane %v124_v49, 2 }
 0x217   :  { %v133_v52 = vadd.f32 %v132_v50, %v131_v48  ;;  %v126_v53 = vadd.f32 %v125_v51, %v124_v49 }
 0x219   :  { %v134_v54 = vrot.slane %v133_v52, 1  ;;  %v127_v55 = vrot.slane %v126_v53, 1 }
 0x21b   :  { %v135_v56 = vadd.f32 %v134_v54, %v133_v52  ;;  %v128_v57 = vadd.f32 %v127_v55, %v126_v53 }
 0x21d   :  { %v138_v58 = vsel %vm90_vm1, %v135_v56, %v128_v57 }
 0x21e   :  { %141 = vst.msk [vmem:[#allocation7] sm:$0x3] %vm140_vm3, %v138_v58 }
 0x21f   :  { %152 = dma.vmem_to_hbm [thread:$0]  %s148_s24, 32, %s150_s27, [#allocation4]  }
 0x220   :  { %258 = dma.done.wait [#allocation4], 32  }
 0x221   :  { %259 = vsyncadd [#allocation4], 4294967264 }
 0x222   :  { %157 = vsyncpa [#allocation3], 1 }
 0x223   :  { %158 = vsyncpa [#allocation6], 1 }
 0x224   :  { %159 = vsyncpa [#allocation4], 1 }

</bundles_post_ra>
